<compile_context>
chip_gen: v5e
topology: v5e:2x2
jax: 0.10.0
libtpu: 0.0.40
codegen_flags: <defaults>
</compile_context>

<pallas_src>
import functools

import jax
import jax.numpy as jnp
from jax import lax
from jax.experimental import pallas as pl
from jax.experimental.pallas import tpu as pltpu


def _layernorm_kernel(x_ref, w_ref, b_ref, o_ref, *, eps):
    """One row-tile of LayerNorm: normalize each row over the last (lane) dim."""
    x = x_ref[...].astype(jnp.float32)                      # [bm, D]
    mean = jnp.mean(x, axis=-1, keepdims=True)              # [bm, 1]
    xc = x - mean
    var = jnp.mean(xc * xc, axis=-1, keepdims=True)         # biased var, like torch
    inv = lax.rsqrt(var + jnp.float32(eps))                 # EUP rsqrt
    y = xc * inv * w_ref[...].astype(jnp.float32) + b_ref[...].astype(jnp.float32)
    o_ref[...] = y.astype(o_ref.dtype)


def _round_up(x, n):
    return ((x + n - 1) // n) * n


def _round_down(x, n):
    return (x // n) * n


def _vmem_capacity_bytes():
    """Physical per-core VMEM, queried at trace time; conservative fallback."""
    try:
        info = pltpu.get_tpu_info()
        cap = getattr(info, "vmem_capacity_bytes", None)
        if cap:
            return int(cap)
    except Exception:
        pass
    return 64 * 1024 * 1024  # v7x-sized fallback (smallest of the three gens)


@functools.partial(jax.jit, static_argnames=("eps", "target_tile_bytes"))
def layernorm_pallas(x, weight, bias, *, eps=1e-6, target_tile_bytes=4 * 1024 * 1024):
    """x: [..., D]; weight: [D]; bias: [D] (zeros when the module has bias=False)."""
    orig_shape = x.shape
    d = orig_shape[-1]
    x2d = x.reshape(-1, d)
    m = x2d.shape[0]
    itemsize = x2d.dtype.itemsize

    # Dtype-aware sublane multiple: 8 rows (f32), 16 (bf16), 32 (int8).
    sub = max(8, 32 // itemsize)

    # Generation-aware VMEM budget: keep double-buffered x/out tiles plus ~3
    # f32-sized compiler intermediates under roughly half of physical VMEM.
    vmem_cap = _vmem_capacity_bytes()
    vmem_budget = min(vmem_cap // 2, 48 * 1024 * 1024)
    per_row_bytes = d * (4 * itemsize + 3 * 4)

    # Row-tile sizing: ~target_tile_bytes of streamed input per grid step,
    # clamped by the VMEM budget and by "at least 2 grid steps" (v7x TC split).
    bm = max(1, target_tile_bytes // (d * itemsize))
    bm = min(bm, max(1, vmem_budget // per_row_bytes))
    bm = min(bm, -(-m // 2))                  # >= 2 grid steps when m allows it
    bm = max(sub, _round_down(bm, sub))
    bm = min(bm, _round_up(m, sub))           # never bigger than needed

    grid_m = pl.cdiv(m, bm)                   # ragged last block handled by Pallas

    tile_bytes = bm * d * itemsize
    f32_tile_bytes = bm * d * 4
    vmem_bytes = int(min(
        vmem_cap,
        max(16 * 1024 * 1024,
            4 * tile_bytes + 3 * f32_tile_bytes + 8 * d * 4 + 2 * 1024 * 1024),
    ))

    w2d = weight.reshape(1, d)
    b2d = bias.reshape(1, d)

    out = pl.pallas_call(
        functools.partial(_layernorm_kernel, eps=eps),
        out_shape=jax.ShapeDtypeStruct((m, d), x.dtype),
        grid_spec=pltpu.PrefetchScalarGridSpec(
            num_scalar_prefetch=0,
            grid=(grid_m,),
            in_specs=[
                pl.BlockSpec((bm, d), lambda i: (i, 0)),   # x row tile (streamed)
                pl.BlockSpec((1, d), lambda i: (0, 0)),    # weight (tiny, invariant)
                pl.BlockSpec((1, d), lambda i: (0, 0)),    # bias   (tiny, invariant)
            ],
            out_specs=pl.BlockSpec((bm, d), lambda i: (i, 0)),
        ),
        compiler_params=pltpu.CompilerParams(
            dimension_semantics=("parallel",),   # rows independent; splits across v7x TCs
            vmem_limit_bytes=vmem_bytes,
        ),
    )(x2d, w2d, b2d)

    return out.reshape(orig_shape)


def _reference(x, weight, bias, eps=1e-6):
    mean = jnp.mean(x, axis=-1, keepdims=True)
    var = jnp.mean((x - mean) ** 2, axis=-1, keepdims=True)
    return (x - mean) * lax.rsqrt(var + eps) * weight + bias


if __name__ == "__main__":
    # Small shapes consistent with the module: tokens [batch, seq, dim].
    # dim=128 is lane-dense (unmasked full vst); seq=10 makes M=20 a non-multiple
    # of the row tile so the pad-free ragged last block path is exercised.
    batch, seq, dim = 2, 10, 128
    eps = 1e-6  # matches nanofm LayerNorm default (torch default would be 1e-5)

    key = jax.random.PRNGKey(0)
    kx, kw = jax.random.split(key, 2)

    x = jax.random.normal(kx, (batch, seq, dim), dtype=jnp.float32)
    # Module init: weight is a trainable scale (random values to exercise it),
    # bias is a zeros buffer since the module defaults to bias=False.
    weight = 1.0 + 0.1 * jax.random.normal(kw, (dim,), dtype=jnp.float32)
    bias = jnp.zeros((dim,), dtype=jnp.float32)

    out = layernorm_pallas(x, weight, bias, eps=eps)
    out = jax.block_until_ready(out)

    ref = _reference(x, weight, bias, eps=eps)
    assert out.shape == x.shape
    assert jnp.allclose(out, ref, atol=1e-5, rtol=1e-5), "mismatch vs reference"

    print("KERNEL_OK")
</pallas_src>

<mosaic_0001>
module attributes {stable_mosaic.version = 11 : i64} {
  func.func @_layernorm_kernel(%arg0: i32, %arg1: memref<8x128xf32, #tpu.memory_space<vmem>>, %arg2: memref<1x128xf32, #tpu.memory_space<vmem>>, %arg3: memref<1x128xf32, #tpu.memory_space<vmem>>, %arg4: memref<8x128xf32, #tpu.memory_space<vmem>>) attributes {dimension_semantics = [#tpu.dimension_semantics<parallel>], iteration_bounds = array<i64: 3>, scalar_prefetch = 0 : i64, scratch_operands = 0 : i64, tpu.core_type = #tpu.core_type<tc>, window_params = [{transform_indices = @transform_0, window_bounds = array<i64: 8, 128>}, {pipeline_mode = #tpu.pipeline_mode<synchronous>, transform_indices = @transform_1, window_bounds = array<i64: 1, 128>}, {pipeline_mode = #tpu.pipeline_mode<synchronous>, transform_indices = @transform_2, window_bounds = array<i64: 1, 128>}, {transform_indices = @transform_3, window_bounds = array<i64: 8, 128>}]} {
    %c0 = arith.constant 0 : index
    %c0_0 = arith.constant 0 : index
    %0 = vector.load %arg1[%c0, %c0_0] : memref<8x128xf32, #tpu.memory_space<vmem>>, vector<8x128xf32>
    %cst = arith.constant dense<0.000000e+00> : vector<8xf32>
    %1 = vector.multi_reduction <add>, %0, %cst [1] : vector<8x128xf32> to vector<8xf32>
    %2 = vector.shape_cast %1 : vector<8xf32> to vector<8x1xf32>
    %cst_1 = arith.constant 1.280000e+02 : f32
    %3 = vector.broadcast %cst_1 : f32 to vector<8x1xf32>
    %4 = arith.divf %2, %3 : vector<8x1xf32>
    %5 = vector.broadcast %4 : vector<8x1xf32> to vector<8x128xf32>
    %6 = arith.subf %0, %5 : vector<8x128xf32>
    %7 = arith.mulf %6, %6 : vector<8x128xf32>
    %cst_2 = arith.constant dense<0.000000e+00> : vector<8xf32>
    %8 = vector.multi_reduction <add>, %7, %cst_2 [1] : vector<8x128xf32> to vector<8xf32>
    %9 = vector.shape_cast %8 : vector<8xf32> to vector<8x1xf32>
    %cst_3 = arith.constant 1.280000e+02 : f32
    %10 = vector.broadcast %cst_3 : f32 to vector<8x1xf32>
    %11 = arith.divf %9, %10 : vector<8x1xf32>
    %cst_4 = arith.constant 9.99999997E-7 : f32
    %12 = vector.broadcast %cst_4 : f32 to vector<8x1xf32>
    %13 = arith.addf %11, %12 : vector<8x1xf32>
    %14 = math.rsqrt %13 : vector<8x1xf32>
    %15 = vector.broadcast %14 : vector<8x1xf32> to vector<8x128xf32>
    %16 = arith.mulf %6, %15 : vector<8x128xf32>
    %c0_5 = arith.constant 0 : index
    %c0_6 = arith.constant 0 : index
    %17 = vector.load %arg2[%c0_5, %c0_6] : memref<1x128xf32, #tpu.memory_space<vmem>>, vector<1x128xf32>
    %18 = vector.broadcast %17 : vector<1x128xf32> to vector<8x128xf32>
    %19 = arith.mulf %16, %18 : vector<8x128xf32>
    %c0_7 = arith.constant 0 : index
    %c0_8 = arith.constant 0 : index
    %20 = vector.load %arg3[%c0_7, %c0_8] : memref<1x128xf32, #tpu.memory_space<vmem>>, vector<1x128xf32>
    %21 = vector.broadcast %20 : vector<1x128xf32> to vector<8x128xf32>
    %22 = arith.addf %19, %21 : vector<8x128xf32>
    %c0_9 = arith.constant 0 : index
    %c0_10 = arith.constant 0 : index
    %23 = vector.load %arg4[%c0_9, %c0_10] : memref<8x128xf32, #tpu.memory_space<vmem>>, vector<8x128xf32>
    tpu.vector_store %arg4[%c0_9, %c0_10], %22 {strides = array<i32>} : memref<8x128xf32, #tpu.memory_space<vmem>>, vector<8x128xf32>,
    return
  }
  func.func @transform_0(%arg0: i32) -> (i32, i32) {
    %c0_i32 = arith.constant 0 : i32
    %c0_i32_0 = arith.constant 0 : i32
    return %arg0, %c0_i32 : i32, i32
  }
  func.func @transform_1(%arg0: i32) -> (i32, i32) {
    %c0_i32 = arith.constant 0 : i32
    %c0_i32_0 = arith.constant 0 : i32
    %c0_i32_1 = arith.constant 0 : i32
    return %c0_i32, %c0_i32_0 : i32, i32
  }
  func.func @transform_2(%arg0: i32) -> (i32, i32) {
    %c0_i32 = arith.constant 0 : i32
    %c0_i32_0 = arith.constant 0 : i32
    %c0_i32_1 = arith.constant 0 : i32
    return %c0_i32, %c0_i32_0 : i32, i32
  }
  func.func @transform_3(%arg0: i32) -> (i32, i32) {
    %c0_i32 = arith.constant 0 : i32
    %c0_i32_0 = arith.constant 0 : i32
    return %arg0, %c0_i32 : i32, i32
  }
}

</mosaic_0001>

<bundles_post_ra>
// kernel: layernorm_pallas.1
= control target key start
LH: loop header
LB: loop body
LE: loop exit
PB: predicated region body
PF: predicated region fallthrough
CT: control target
= control target key end

     0   :  { %s311_s12 = smov 0   ;;  %s341_s0 = inlined_call_operand.vmem [shape: f32[20,128], index: 0, kind: input, shape index: {}]   ;;  %s342_s1 = inlined_call_operand.vmem [shape: f32[1,128], index: 1, kind: input, shape index: {}]   ;;  %s343_s2 = inlined_call_operand.vmem [shape: f32[1,128], index: 2, kind: input, shape index: {}]   ;;  %s344_s3 = inlined_call_operand.vmem [shape: f32[20,128], index: 3, kind: output, shape index: {}]  }
   0x1 LB: > { %s258_s13 = sadd.s32 4294967295, %s288_s12   ;;  %p262_p0 = scmp.ge.s32.totalorder %s288_s12, 1  ;;  %s288_s12 = sphi %s311_s12, %s13_s12  }
   0x2   : > { %p136_p1 = scmp.lt.s32.totalorder %s288_s12, 4 }
   0x4   : > { %p137_p2 = pnand %p262_p0, %p136_p1 }
   0x5   : > { %p158_p3 = scmp.lt.s32.totalorder (!%p137_p2), %s258_s13, 2 }
   0x6   : > { %140 = sbr.rel (%p137_p2) target bundleno = 282 (0x11a), region = 32 }
   0xb   : > { %s346_s13 = smov (!%p158_p3, %s258_s13), 2  ;;  %v290_v1 = vmov 128.0   ;;  %v276_v21 = vld [vmem:[%s342_s1] ss:$0 sm:$0xff] }
   0xc   : > { %s263_s14 = sshll.u32 %s346_s13, 3  ;;  %278 = vrcp.f32 %v290_v1  ;;  %v277_v23 = vld [vmem:[%s343_s2] ss:$0 sm:$0xff] }
   0xd   : > { %s161_s17 = scalar_lea.vmem %s341_s0, %s263_s14  ;;  %s165_s24 = scalar_lea.vmem %s344_s3, %s263_s14 }
   0xe   : > { %v166_v0 = vld [vmem:[%s161_s17] sm:$0xff] }
   0xf   : > { %167 = vadd.xlane.f32.xlu0 %v166_v0 }
  0x12   : > { %v279_v2 = vpop.eup %278 }
  0x13   : > { %v170_v3 = vmul.f32 128.0, %v279_v2  ;;  %vm174_vm0 = vweird.f32 %v279_v2 }
  0x15   : > { %v171_v4 = vsub.f32 1.0, %v170_v3 }
  0x17   : > { %v172_v5 = vmul.f32 %v279_v2, %v171_v4 }
  0x19   : > { %v173_v6 = vadd.f32 %v279_v2, %v172_v5 }
  0x1b   : > { %v175_v7 = vsel %vm174_vm0, %v279_v2, %v173_v6 }
  0x82   : > { %v168_v8 = vpop.xlane.xlu0 %167 }
  0x83   : > { %v176_v9 = vmul.f32 %v175_v7, %v168_v8 }
  0x85   : > { %v177_v10 = vsub.f32 %v166_v0, %v176_v9 }
  0x87   : > { %v178_v11 = vmul.f32 %v177_v10, %v177_v10 }
  0x89   : > { %179 = vadd.xlane.f32.xlu0 %v178_v11 }
  0xfc   : > { %v180_v12 = vpop.xlane.xlu0 %179 }
  0xfd   : > { %v181_v13 = vmul.f32 %v180_v12, %v175_v7 }
  0xff   : > { %v182_v14 = vadd.f32 1e-06, %v181_v13 }
 0x101   : > { %280 = vrsqrt.f32 %v182_v14  ;;  %vm189_vm2 = vweird.f32 %v182_v14 }
 0x107   : > { %v281_v15 = vpop.eup %280 }
 0x108   : > { %v184_v16 = vmul.f32 %v281_v15, %v182_v14  ;;  %vm190_vm1 = vweird.f32 %v281_v15 }
 0x109   : > { %vm191_vm3 = vmor %vm189_vm2, %vm190_vm1 }
 0x10a   : > { %v185_v17 = vmul.f32 %v281_v15, %v184_v16 }
 0x10c   : > { %v186_v18 = vmul.f32 0.5, %v185_v17 }
 0x10e   : > { %v187_v19 = vsub.f32 1.5, %v186_v18 }
 0x110   : > { %v188_v20 = vmul.f32 %v281_v15, %v187_v19 }
 0x112   : > { %v192_v22 = vsel %vm191_vm3, %v281_v15, %v188_v20 }
 0x113   : > { %v193_v24 = vmul.f32 %v192_v22, %v177_v10 }
 0x115   : > { %v198_v25 = vmul.f32 %v276_v21, %v193_v24 }
 0x117   : > { %v203_v26 = vadd.f32 %v277_v23, %v198_v25 }
 0x119   : > { %204 = vst [vmem:[%s165_s24] sm:$0xff] %v203_v26 }
 0x11a PF: > { %s13_s12 = sadd.s32 1, %s288_s12  }
 0x11b   : > { %p10_p4 = scmp.ge.s32.totalorder %s13_s12, 5  }
 0x11d   :  { %12 = sbr.rel (!%p10_p4) target bundleno = 1 (0x1), region = 62 }

</bundles_post_ra>
